<compile_context>
chip_gen: v7x
topology: tpu7x:2x2x1
jax: 0.10.0
libtpu: 0.0.40
codegen_flags: <defaults>
</compile_context>

<pallas_src>
import functools
import math

import numpy as np
import jax
import jax.numpy as jnp
from jax import lax
from jax.experimental import pallas as pl
from jax.experimental.pallas import tpu as pltpu

_PI = math.pi
_LANES = 128
_CHUNK = 8            # rows per strip-mined inner step (one f32 vreg / plane)


def _round_up(x, m):
    return ((x + m - 1) // m) * m


# ----------------------------------------------------------------------------
# Per-box loss math on (_CHUNK, 128) coordinate planes (all float32)
# ----------------------------------------------------------------------------
def _loss_from_planes(px1, py1, px2, py2, tx1, ty1, tx2, ty2, *,
                      eps, iou_weight, alpha, image_w, image_h):
    kx = 2.0 * _PI / image_w          # x -> phi scale
    ky = _PI / image_h                # y -> theta scale

    def sphere_angle_sq(d_phi, d_the, s_the_arg):
        # dot(v1, v2) of two unit-sphere points via product-to-sum identities:
        #   dot = 0.5*[cos(dThe)*(1+cos(dPhi)) + cos(sThe)*(cos(dPhi)-1)]
        # The true sThe = s_the_arg - pi, so cos(sThe) = -cos(s_the_arg)
        # (the -pi/2 per-point offsets fold into this single negation; the
        # -pi phi offsets cancel inside cos(dPhi)).  Only 3 transcendentals
        # per pair, and (1 - dot) is formed directly (no cancellation).
        c_dp = jnp.cos(d_phi)
        c_dt = jnp.cos(d_the)
        c_st = -jnp.cos(s_the_arg)
        one_minus_dot = 1.0 - 0.5 * (c_dt * (1.0 + c_dp) + c_st * (c_dp - 1.0))
        one_minus_dot = jnp.clip(one_minus_dot, 0.0, 2.0)
        return one_minus_dot * one_minus_dot

    # Angle term between the two box centers.
    ab_ctr = sphere_angle_sq(
        ((px1 + px2) - (tx1 + tx2)) * (0.5 * kx),
        ((py1 + py2) - (ty1 + ty2)) * (0.5 * ky),
        ((py1 + py2) + (ty1 + ty2)) * (0.5 * ky))

    # Plain IoU term (divide -> EUP approx reciprocal; VALU is binding slot).
    w = jnp.maximum(jnp.minimum(px2, tx2) - jnp.maximum(px1, tx1), 0.0)
    h = jnp.maximum(jnp.minimum(py2, ty2) - jnp.maximum(py1, ty1), 0.0)
    overlap = w * h
    ap = (px2 - px1) * (py2 - py1)
    ag = (tx2 - tx1) * (ty2 - ty1)
    ious = overlap * pl.reciprocal(ap + ag - overlap + eps, approx=True)

    # Angle term of the enclosing-box corners.
    ex1 = jnp.minimum(px1, tx1)
    ey1 = jnp.minimum(py1, ty1)
    ex2 = jnp.maximum(px2, tx2)
    ey2 = jnp.maximum(py2, ty2)
    ab_enclose = sphere_angle_sq((ex1 - ex2) * kx, (ey1 - ey2) * ky,
                                 (ey1 + ey2) * ky) + eps

    return (iou_weight * (1.0 - ious)
            + alpha * ab_ctr * pl.reciprocal(ab_enclose, approx=True))


# ----------------------------------------------------------------------------
# Pallas kernels
# ----------------------------------------------------------------------------
def _abiou_elem_kernel(*refs, has_weight, n_chunks, eps, iou_weight, alpha,
                       image_w, image_h):
    # boxes_ref block: (8, n_chunks, _CHUNK, 128); each [i, c] view is one
    # native (8, 128) f32 tile.  Strip-mined so live vregs stay ~20.
    if has_weight:
        boxes_ref, w_ref, out_ref = refs
    else:
        boxes_ref, out_ref = refs
        w_ref = None

    def body(c, carry):
        planes = [boxes_ref[i, c] for i in range(8)]
        loss = _loss_from_planes(*planes, eps=eps, iou_weight=iou_weight,
                                 alpha=alpha, image_w=image_w, image_h=image_h)
        if w_ref is not None:
            loss = loss * w_ref[c]
        out_ref[c] = loss
        return carry

    lax.fori_loop(0, n_chunks, body, 0, unroll=min(2, n_chunks))


def _abiou_sum_kernel(*refs, has_weight, n_valid, tr, n_chunks, eps,
                      iou_weight, alpha, image_w, image_h):
    if has_weight:
        boxes_ref, w_ref, out_ref = refs
    else:
        boxes_ref, out_ref = refs
        w_ref = None

    if w_ref is None:
        # Padded boxes produce a finite loss (== iou_weight); mask them with a
        # flat-index compare instead of DMAing a (tr,128) ones array.  The
        # iota is hoisted out of the loop (JAX does not CSE broadcast_in_dim).
        idx0 = (lax.broadcasted_iota(jnp.int32, (_CHUNK, _LANES), 0) * _LANES
                + lax.broadcasted_iota(jnp.int32, (_CHUNK, _LANES), 1))
        tile_base = pl.program_id(0) * (tr * _LANES)

    def body(c, acc):
        planes = [boxes_ref[i, c] for i in range(8)]
        loss = _loss_from_planes(*planes, eps=eps, iou_weight=iou_weight,
                                 alpha=alpha, image_w=image_w, image_h=image_h)
        if w_ref is not None:
            # Padded lanes carry weight == 0 (loss there is finite because
            # ab_enclose >= eps, so 0 * loss == 0 exactly).
            loss = loss * w_ref[c]
        else:
            idx = tile_base + c * (_CHUNK * _LANES) + idx0
            loss = jnp.where(idx < n_valid, loss, 0.0)
        return acc + loss

    acc = lax.fori_loop(0, n_chunks, body,
                        jnp.zeros((_CHUNK, _LANES), jnp.float32),
                        unroll=min(2, n_chunks))
    out_ref[0] = acc


# ----------------------------------------------------------------------------
# Host-side wrappers
# ----------------------------------------------------------------------------
def _tiling(n, block_rows):
    block_rows = max(_CHUNK, _round_up(block_rows, _CHUNK))
    rows = pl.cdiv(max(n, 1), _LANES)
    # Aim for >= 2 grid steps so the "parallel" axis can use both v7x
    # TensorCores (no-op on single-TC v5e/v6e).
    half = _round_up(pl.cdiv(rows, 2), _CHUNK)
    tr = min(block_rows, half)
    rows_pad = _round_up(rows, tr)
    return rows_pad, tr


def _pack_boxes(pred, target, rows_pad):
    # TODO(synk): ideally the producer emits this (8, C, 8, 128) layout
    # directly; this pack/transpose prepass is an extra HBM pass over 32 B/box.
    n = pred.shape[0]
    both = jnp.concatenate(
        [pred.astype(jnp.float32), target.astype(jnp.float32)], axis=1)  # (n,8)
    both = jnp.pad(both, ((0, rows_pad * _LANES - n), (0, 0)))
    return both.T.reshape(8, rows_pad // _CHUNK, _CHUNK, _LANES)


def _pack_weight(weight, n, rows_pad):
    w = weight.astype(jnp.float32).reshape(n)
    w = jnp.pad(w, (0, rows_pad * _LANES - n))
    return w.reshape(rows_pad // _CHUNK, _CHUNK, _LANES)


def _abiou_elementwise(pred, target, weight=None, *, eps, iou_weight, alpha,
                       image_w, image_h, block_rows=512):
    """Per-box (optionally weighted) ABIoU loss, shape (n,), float32."""
    n = pred.shape[0]
    rows_pad, tr = _tiling(n, block_rows)
    tc = tr // _CHUNK
    grid = rows_pad // tr
    boxes = _pack_boxes(pred, target, rows_pad)
    has_weight = weight is not None

    kernel = functools.partial(
        _abiou_elem_kernel, has_weight=has_weight, n_chunks=tc,
        eps=float(eps), iou_weight=float(iou_weight), alpha=float(alpha),
        image_w=float(image_w), image_h=float(image_h))

    in_specs = [pl.BlockSpec((8, tc, _CHUNK, _LANES), lambda i: (0, i, 0, 0))]
    args = [boxes]
    if has_weight:
        in_specs.append(pl.BlockSpec((tc, _CHUNK, _LANES), lambda i: (i, 0, 0)))
        args.append(_pack_weight(weight, n, rows_pad))

    out = pl.pallas_call(
        kernel,
        out_shape=jax.ShapeDtypeStruct((rows_pad // _CHUNK, _CHUNK, _LANES),
                                       jnp.float32),
        grid=(grid,),
        in_specs=in_specs,
        out_specs=pl.BlockSpec((tc, _CHUNK, _LANES), lambda i: (i, 0, 0)),
        compiler_params=pltpu.CompilerParams(
            dimension_semantics=("parallel",)),
    )(*args)
    return out.reshape(-1)[:n]


def _abiou_weighted_sum(pred, target, weight, *, eps, iou_weight, alpha,
                        image_w, image_h, block_rows=512):
    """sum_i loss_i * w_i (w_i = 1 if weight is None), fused in-kernel."""
    n = pred.shape[0]
    rows_pad, tr = _tiling(n, block_rows)
    tc = tr // _CHUNK
    grid = rows_pad // tr
    boxes = _pack_boxes(pred, target, rows_pad)
    has_weight = weight is not None

    kernel = functools.partial(
        _abiou_sum_kernel, has_weight=has_weight, n_valid=n, tr=tr,
        n_chunks=tc, eps=float(eps), iou_weight=float(iou_weight),
        alpha=float(alpha), image_w=float(image_w), image_h=float(image_h))

    in_specs = [pl.BlockSpec((8, tc, _CHUNK, _LANES), lambda i: (0, i, 0, 0))]
    args = [boxes]
    if has_weight:
        in_specs.append(pl.BlockSpec((tc, _CHUNK, _LANES), lambda i: (i, 0, 0)))
        args.append(_pack_weight(weight, n, rows_pad))

    partials = pl.pallas_call(
        kernel,
        out_shape=jax.ShapeDtypeStruct((grid, _CHUNK, _LANES), jnp.float32),
        grid=(grid,),
        in_specs=in_specs,
        out_specs=pl.BlockSpec((1, _CHUNK, _LANES), lambda i: (i, 0, 0)),
        compiler_params=pltpu.CompilerParams(
            dimension_semantics=("parallel",)),
    )(*args)
    return jnp.sum(partials)


# ----------------------------------------------------------------------------
# mmdet ABIoULoss module (weighted_loss semantics)
# ----------------------------------------------------------------------------
class ABIoULoss:
    """JAX/Pallas re-implementation of mmdet's ABIoULoss forward pass."""

    def __init__(self, eps=1e-6, reduction='mean', loss_weight=1.0,
                 iou_weight=1.0, alpha=1.0, image_w=960, image_h=480):
        self.eps = eps
        self.reduction = reduction
        self.loss_weight = loss_weight
        self.iou_weight = iou_weight
        self.alpha = alpha
        self.image_w = image_w
        self.image_h = image_h

    def _kernel_kwargs(self):
        return dict(eps=self.eps, iou_weight=self.iou_weight,
                    alpha=self.alpha, image_w=self.image_w,
                    image_h=self.image_h)

    def __call__(self, pred, target, weight=None, avg_factor=None,
                 reduction_override=None):
        # mmdet's all-zero-weight early exit needs a concrete bool; only check
        # for host (numpy) weights so eager jax-array calls do not pay a
        # device reduction + host sync.  Under jit it is dead code anyway
        # (the regular path gives the same forward value of 0).
        if weight is not None and isinstance(weight, (np.ndarray, np.generic)):
            if not np.any(np.asarray(weight) > 0):
                w = np.asarray(weight)
                if np.asarray(pred).ndim == w.ndim + 1:
                    w = w[:, None]
                return jnp.sum(jnp.asarray(pred) * jnp.asarray(w))

        assert reduction_override in (None, 'none', 'mean', 'sum')
        reduction = (reduction_override if reduction_override
                     else self.reduction)
        if weight is not None and weight.ndim > 1:
            assert weight.shape == pred.shape
            weight = weight.mean(-1)

        n = pred.shape[0]
        kw = self._kernel_kwargs()

        if reduction == 'none':
            # Weight multiply is fused into the elementwise kernel.
            loss = _abiou_elementwise(pred, target, weight, **kw)
            # (mmdet: avg_factor with reduction='none' leaves loss unreduced)
            return self.loss_weight * loss

        if reduction == 'sum' and avg_factor is not None:
            raise ValueError('avg_factor can not be used with reduction="sum"')

        total = _abiou_weighted_sum(pred, target, weight, **kw)
        if reduction == 'sum':
            loss = total
        elif avg_factor is None:
            loss = total / n
        else:
            loss = total / (avg_factor + jnp.finfo(jnp.float32).eps)
        return self.loss_weight * loss


# ----------------------------------------------------------------------------
# Demo / smoke test
# ----------------------------------------------------------------------------
if __name__ == "__main__":
    image_w, image_h = 960, 480

    def make_boxes(key, n):
        k1, k2, k3, k4 = jax.random.split(key, 4)
        p_xy = jax.random.uniform(k1, (n, 2), jnp.float32) * jnp.array(
            [image_w * 0.8, image_h * 0.8], jnp.float32)
        p_wh = 10.0 + jax.random.uniform(k2, (n, 2), jnp.float32) * 80.0
        pred = jnp.concatenate([p_xy, p_xy + p_wh], axis=1)
        t_xy = jax.random.uniform(k3, (n, 2), jnp.float32) * jnp.array(
            [image_w * 0.8, image_h * 0.8], jnp.float32)
        t_wh = 10.0 + jax.random.uniform(k4, (n, 2), jnp.float32) * 80.0
        target = jnp.concatenate([t_xy, t_xy + t_wh], axis=1)
        return pred, target

    # Pure-JAX reference (same formulation as the PyTorch module).
    def ref_elem(pred, target, eps=1e-6, iou_weight=1.0, alpha=1.0):
        def bphi(b):
            xc = (b[:, 0] + b[:, 2]) * 0.5
            yc = (b[:, 1] + b[:, 3]) * 0.5
            return (xc / image_w * 2 * jnp.pi - jnp.pi,
                    yc / image_h * jnp.pi - 0.5 * jnp.pi)

        def ang(p1, t1, p2, t2):
            prod = (jnp.cos(p1) * jnp.cos(t1) * jnp.cos(p2) * jnp.cos(t2) +
                    jnp.sin(p1) * jnp.cos(t1) * jnp.sin(p2) * jnp.cos(t2) +
                    jnp.sin(t1) * jnp.sin(t2))
            return (jnp.clip(prod, -1.0, 1.0) - 1.0) ** 2

        pp, pt = bphi(pred)
        tp, tt = bphi(target)
        ab_ctr = ang(pp, pt, tp, tt)
        lt = jnp.maximum(pred[:, :2], target[:, :2])
        rb = jnp.minimum(pred[:, 2:], target[:, 2:])
        wh = jnp.maximum(rb - lt, 0.0)
        overlap = wh[:, 0] * wh[:, 1]
        ap = (pred[:, 2] - pred[:, 0]) * (pred[:, 3] - pred[:, 1])
        ag = (target[:, 2] - target[:, 0]) * (target[:, 3] - target[:, 1])
        ious = overlap / (ap + ag - overlap + eps)
        e1 = jnp.minimum(pred[:, :2], target[:, :2])
        e2 = jnp.maximum(pred[:, 2:], target[:, 2:])
        ep1 = e1[:, 0] / image_w * 2 * jnp.pi - jnp.pi
        et1 = e1[:, 1] / image_h * jnp.pi - 0.5 * jnp.pi
        ep2 = e2[:, 0] / image_w * 2 * jnp.pi - jnp.pi
        et2 = e2[:, 1] / image_h * jnp.pi - 0.5 * jnp.pi
        ab_enc = ang(ep1, et1, ep2, et2) + eps
        return iou_weight * (1 - ious) + alpha * ab_ctr / ab_enc

    loss_mod = ABIoULoss(eps=1e-6, reduction='mean', loss_weight=1.0,
                         iou_weight=1.0, alpha=1.0,
                         image_w=image_w, image_h=image_h)

    # --- small case (n = 8): mean / none / weighted-none / sum / weighted-mean
    key = jax.random.PRNGKey(0)
    k_boxes, k_w, k_big = jax.random.split(key, 3)
    n = 8
    pred, target = make_boxes(k_boxes, n)
    weight = jax.random.uniform(k_w, (n,), jnp.float32) * 2.0

    ref = ref_elem(pred, target)

    loss_mean = loss_mod(pred, target)
    loss_none = loss_mod(pred, target, reduction_override='none')
    loss_none_w = loss_mod(pred, target, weight=weight,
                           reduction_override='none')
    loss_sum = loss_mod(pred, target, reduction_override='sum')
    loss_wavg = loss_mod(pred, target, weight=weight, avg_factor=4.0)
    jax.block_until_ready((loss_mean, loss_none, loss_none_w, loss_sum,
                           loss_wavg))

    assert jnp.allclose(loss_none, ref, rtol=5e-3, atol=1e-4), (loss_none, ref)
    assert jnp.allclose(loss_none_w, ref * weight, rtol=5e-3, atol=1e-4)
    assert jnp.allclose(loss_mean, jnp.mean(ref), rtol=5e-3, atol=1e-4)
    assert jnp.allclose(loss_sum, jnp.sum(ref), rtol=5e-3, atol=1e-3)
    ref_wavg = jnp.sum(ref * weight) / (4.0 + jnp.finfo(jnp.float32).eps)
    assert jnp.allclose(loss_wavg, ref_wavg, rtol=5e-3, atol=1e-3)

    # --- larger case: 2-step ("parallel") grid + strip-mined chunk loop ---
    n_big = 5000
    pred_b, target_b = make_boxes(k_big, n_big)
    ref_b = ref_elem(pred_b, target_b)
    elem_b = _abiou_elementwise(pred_b, target_b, eps=1e-6, iou_weight=1.0,
                                alpha=1.0, image_w=image_w, image_h=image_h)
    sum_b = _abiou_weighted_sum(pred_b, target_b, None, eps=1e-6,
                                iou_weight=1.0, alpha=1.0, image_w=image_w,
                                image_h=image_h)
    wsum_b = _abiou_weighted_sum(pred_b, target_b,
                                 jnp.ones((n_big,), jnp.float32) * 0.5,
                                 eps=1e-6, iou_weight=1.0, alpha=1.0,
                                 image_w=image_w, image_h=image_h)
    jax.block_until_ready((elem_b, sum_b, wsum_b))
    assert jnp.allclose(elem_b, ref_b, rtol=5e-3, atol=1e-4)
    assert jnp.allclose(sum_b, jnp.sum(ref_b), rtol=5e-3)
    assert jnp.allclose(wsum_b, 0.5 * jnp.sum(ref_b), rtol=5e-3)

    print("KERNEL_OK")
</pallas_src>

<mosaic_0001>
module attributes {stable_mosaic.version = 11 : i64} {
  func.func @_abiou_sum_kernel(%arg0: i32, %arg1: memref<8x1x8x128xf32, #tpu.memory_space<vmem>>, %arg2: memref<1x8x128xf32, #tpu.memory_space<vmem>>) attributes {dimension_semantics = [#tpu.dimension_semantics<parallel>], iteration_bounds = array<i64: 1>, scalar_prefetch = 0 : i64, scratch_operands = 0 : i64, tpu.core_type = #tpu.core_type<tc>, window_params = [{transform_indices = @transform_0, window_bounds = array<i64: 8, 1, 8, 128>}, {transform_indices = @transform_1, window_bounds = array<i64: 1, 8, 128>}]} {
    %0 = tpu.iota {dimensions = array<i32: 0>} : vector<8x128xi32>
    %c128_i32 = arith.constant 128 : i32
    %1 = vector.broadcast %c128_i32 : i32 to vector<8x128xi32>
    %2 = arith.muli %0, %1 : vector<8x128xi32>
    %3 = tpu.iota {dimensions = array<i32: 1>} : vector<8x128xi32>
    %4 = arith.addi %2, %3 : vector<8x128xi32>
    %c1024_i32 = arith.constant 1024 : i32
    %5 = arith.muli %arg0, %c1024_i32 : i32
    %cst = arith.constant 0.000000e+00 : f32
    %6 = vector.broadcast %cst : f32 to vector<8x128xf32>
    %c0_i32 = arith.constant 0 : i32
    %c0 = arith.constant 0 : index
    %7 = arith.index_cast %c0_i32 : i32 to index
    %c0_0 = arith.constant 0 : index
    %c0_1 = arith.constant 0 : index
    %8 = vector.load %arg1[%c0, %7, %c0_0, %c0_1] : memref<8x1x8x128xf32, #tpu.memory_space<vmem>>, vector<1x1x8x128xf32>
    %9 = vector.shape_cast %8 : vector<1x1x8x128xf32> to vector<8x128xf32>
    %c1 = arith.constant 1 : index
    %10 = arith.index_cast %c0_i32 : i32 to index
    %c0_2 = arith.constant 0 : index
    %c0_3 = arith.constant 0 : index
    %11 = vector.load %arg1[%c1, %10, %c0_2, %c0_3] : memref<8x1x8x128xf32, #tpu.memory_space<vmem>>, vector<1x1x8x128xf32>
    %12 = vector.shape_cast %11 : vector<1x1x8x128xf32> to vector<8x128xf32>
    %c2 = arith.constant 2 : index
    %13 = arith.index_cast %c0_i32 : i32 to index
    %c0_4 = arith.constant 0 : index
    %c0_5 = arith.constant 0 : index
    %14 = vector.load %arg1[%c2, %13, %c0_4, %c0_5] : memref<8x1x8x128xf32, #tpu.memory_space<vmem>>, vector<1x1x8x128xf32>
    %15 = vector.shape_cast %14 : vector<1x1x8x128xf32> to vector<8x128xf32>
    %c3 = arith.constant 3 : index
    %16 = arith.index_cast %c0_i32 : i32 to index
    %c0_6 = arith.constant 0 : index
    %c0_7 = arith.constant 0 : index
    %17 = vector.load %arg1[%c3, %16, %c0_6, %c0_7] : memref<8x1x8x128xf32, #tpu.memory_space<vmem>>, vector<1x1x8x128xf32>
    %18 = vector.shape_cast %17 : vector<1x1x8x128xf32> to vector<8x128xf32>
    %c4 = arith.constant 4 : index
    %19 = arith.index_cast %c0_i32 : i32 to index
    %c0_8 = arith.constant 0 : index
    %c0_9 = arith.constant 0 : index
    %20 = vector.load %arg1[%c4, %19, %c0_8, %c0_9] : memref<8x1x8x128xf32, #tpu.memory_space<vmem>>, vector<1x1x8x128xf32>
    %21 = vector.shape_cast %20 : vector<1x1x8x128xf32> to vector<8x128xf32>
    %c5 = arith.constant 5 : index
    %22 = arith.index_cast %c0_i32 : i32 to index
    %c0_10 = arith.constant 0 : index
    %c0_11 = arith.constant 0 : index
    %23 = vector.load %arg1[%c5, %22, %c0_10, %c0_11] : memref<8x1x8x128xf32, #tpu.memory_space<vmem>>, vector<1x1x8x128xf32>
    %24 = vector.shape_cast %23 : vector<1x1x8x128xf32> to vector<8x128xf32>
    %c6 = arith.constant 6 : index
    %25 = arith.index_cast %c0_i32 : i32 to index
    %c0_12 = arith.constant 0 : index
    %c0_13 = arith.constant 0 : index
    %26 = vector.load %arg1[%c6, %25, %c0_12, %c0_13] : memref<8x1x8x128xf32, #tpu.memory_space<vmem>>, vector<1x1x8x128xf32>
    %27 = vector.shape_cast %26 : vector<1x1x8x128xf32> to vector<8x128xf32>
    %c7 = arith.constant 7 : index
    %28 = arith.index_cast %c0_i32 : i32 to index
    %c0_14 = arith.constant 0 : index
    %c0_15 = arith.constant 0 : index
    %29 = vector.load %arg1[%c7, %28, %c0_14, %c0_15] : memref<8x1x8x128xf32, #tpu.memory_space<vmem>>, vector<1x1x8x128xf32>
    %30 = vector.shape_cast %29 : vector<1x1x8x128xf32> to vector<8x128xf32>
    %31 = arith.addf %9, %15 : vector<8x128xf32>
    %32 = arith.addf %21, %27 : vector<8x128xf32>
    %33 = arith.subf %31, %32 : vector<8x128xf32>
    %cst_16 = arith.constant 0.00327249244 : f32
    %34 = vector.broadcast %cst_16 : f32 to vector<8x128xf32>
    %35 = arith.mulf %33, %34 : vector<8x128xf32>
    %36 = arith.addf %12, %18 : vector<8x128xf32>
    %37 = arith.addf %24, %30 : vector<8x128xf32>
    %38 = arith.subf %36, %37 : vector<8x128xf32>
    %cst_17 = arith.constant 0.00327249244 : f32
    %39 = vector.broadcast %cst_17 : f32 to vector<8x128xf32>
    %40 = arith.mulf %38, %39 : vector<8x128xf32>
    %41 = arith.addf %12, %18 : vector<8x128xf32>
    %42 = arith.addf %24, %30 : vector<8x128xf32>
    %43 = arith.addf %41, %42 : vector<8x128xf32>
    %cst_18 = arith.constant 0.00327249244 : f32
    %44 = vector.broadcast %cst_18 : f32 to vector<8x128xf32>
    %45 = arith.mulf %43, %44 : vector<8x128xf32>
    %46 = math.cos %35 : vector<8x128xf32>
    %47 = math.cos %40 : vector<8x128xf32>
    %48 = math.cos %45 : vector<8x128xf32>
    %cst_19 = arith.constant 0.000000e+00 : f32
    %49 = vector.broadcast %cst_19 : f32 to vector<8x128xf32>
    %50 = arith.subf %49, %48 : vector<8x128xf32>
    %cst_20 = arith.constant 1.000000e+00 : f32
    %51 = vector.broadcast %cst_20 : f32 to vector<8x128xf32>
    %52 = arith.addf %51, %46 : vector<8x128xf32>
    %53 = arith.mulf %47, %52 : vector<8x128xf32>
    %cst_21 = arith.constant 1.000000e+00 : f32
    %54 = vector.broadcast %cst_21 : f32 to vector<8x128xf32>
    %55 = arith.subf %46, %54 : vector<8x128xf32>
    %56 = arith.mulf %50, %55 : vector<8x128xf32>
    %57 = arith.addf %53, %56 : vector<8x128xf32>
    %cst_22 = arith.constant 5.000000e-01 : f32
    %58 = vector.broadcast %cst_22 : f32 to vector<8x128xf32>
    %59 = arith.mulf %58, %57 : vector<8x128xf32>
    %cst_23 = arith.constant 1.000000e+00 : f32
    %60 = vector.broadcast %cst_23 : f32 to vector<8x128xf32>
    %61 = arith.subf %60, %59 : vector<8x128xf32>
    %cst_24 = arith.constant 0.000000e+00 : f32
    %cst_25 = arith.constant 2.000000e+00 : f32
    %62 = vector.broadcast %cst_24 : f32 to vector<8x128xf32>
    %63 = arith.maximumf %62, %61 : vector<8x128xf32>
    %64 = vector.broadcast %cst_25 : f32 to vector<8x128xf32>
    %65 = arith.minimumf %64, %63 : vector<8x128xf32>
    %66 = arith.mulf %65, %65 : vector<8x128xf32>
    %67 = arith.minimumf %15, %27 : vector<8x128xf32>
    %68 = arith.maximumf %9, %21 : vector<8x128xf32>
    %69 = arith.subf %67, %68 : vector<8x128xf32>
    %cst_26 = arith.constant 0.000000e+00 : f32
    %70 = vector.broadcast %cst_26 : f32 to vector<8x128xf32>
    %71 = arith.maximumf %69, %70 : vector<8x128xf32>
    %72 = arith.minimumf %18, %30 : vector<8x128xf32>
    %73 = arith.maximumf %12, %24 : vector<8x128xf32>
    %74 = arith.subf %72, %73 : vector<8x128xf32>
    %cst_27 = arith.constant 0.000000e+00 : f32
    %75 = vector.broadcast %cst_27 : f32 to vector<8x128xf32>
    %76 = arith.maximumf %74, %75 : vector<8x128xf32>
    %77 = arith.mulf %71, %76 : vector<8x128xf32>
    %78 = arith.subf %15, %9 : vector<8x128xf32>
    %79 = arith.subf %18, %12 : vector<8x128xf32>
    %80 = arith.mulf %78, %79 : vector<8x128xf32>
    %81 = arith.subf %27, %21 : vector<8x128xf32>
    %82 = arith.subf %30, %24 : vector<8x128xf32>
    %83 = arith.mulf %81, %82 : vector<8x128xf32>
    %84 = arith.addf %80, %83 : vector<8x128xf32>
    %85 = arith.subf %84, %77 : vector<8x128xf32>
    %cst_28 = arith.constant 9.99999997E-7 : f32
    %86 = vector.broadcast %cst_28 : f32 to vector<8x128xf32>
    %87 = arith.addf %85, %86 : vector<8x128xf32>
    %88 = tpu.reciprocal %87 {approx = true} : vector<8x128xf32> -> vector<8x128xf32>
    %89 = arith.mulf %77, %88 : vector<8x128xf32>
    %90 = arith.minimumf %9, %21 : vector<8x128xf32>
    %91 = arith.minimumf %12, %24 : vector<8x128xf32>
    %92 = arith.maximumf %15, %27 : vector<8x128xf32>
    %93 = arith.maximumf %18, %30 : vector<8x128xf32>
    %94 = arith.subf %90, %92 : vector<8x128xf32>
    %cst_29 = arith.constant 0.00654498488 : f32
    %95 = vector.broadcast %cst_29 : f32 to vector<8x128xf32>
    %96 = arith.mulf %94, %95 : vector<8x128xf32>
    %97 = arith.subf %91, %93 : vector<8x128xf32>
    %cst_30 = arith.constant 0.00654498488 : f32
    %98 = vector.broadcast %cst_30 : f32 to vector<8x128xf32>
    %99 = arith.mulf %97, %98 : vector<8x128xf32>
    %100 = arith.addf %91, %93 : vector<8x128xf32>
    %cst_31 = arith.constant 0.00654498488 : f32
    %101 = vector.broadcast %cst_31 : f32 to vector<8x128xf32>
    %102 = arith.mulf %100, %101 : vector<8x128xf32>
    %103 = math.cos %96 : vector<8x128xf32>
    %104 = math.cos %99 : vector<8x128xf32>
    %105 = math.cos %102 : vector<8x128xf32>
    %cst_32 = arith.constant 0.000000e+00 : f32
    %106 = vector.broadcast %cst_32 : f32 to vector<8x128xf32>
    %107 = arith.subf %106, %105 : vector<8x128xf32>
    %cst_33 = arith.constant 1.000000e+00 : f32
    %108 = vector.broadcast %cst_33 : f32 to vector<8x128xf32>
    %109 = arith.addf %108, %103 : vector<8x128xf32>
    %110 = arith.mulf %104, %109 : vector<8x128xf32>
    %cst_34 = arith.constant 1.000000e+00 : f32
    %111 = vector.broadcast %cst_34 : f32 to vector<8x128xf32>
    %112 = arith.subf %103, %111 : vector<8x128xf32>
    %113 = arith.mulf %107, %112 : vector<8x128xf32>
    %114 = arith.addf %110, %113 : vector<8x128xf32>
    %cst_35 = arith.constant 5.000000e-01 : f32
    %115 = vector.broadcast %cst_35 : f32 to vector<8x128xf32>
    %116 = arith.mulf %115, %114 : vector<8x128xf32>
    %cst_36 = arith.constant 1.000000e+00 : f32
    %117 = vector.broadcast %cst_36 : f32 to vector<8x128xf32>
    %118 = arith.subf %117, %116 : vector<8x128xf32>
    %cst_37 = arith.constant 0.000000e+00 : f32
    %cst_38 = arith.constant 2.000000e+00 : f32
    %119 = vector.broadcast %cst_37 : f32 to vector<8x128xf32>
    %120 = arith.maximumf %119, %118 : vector<8x128xf32>
    %121 = vector.broadcast %cst_38 : f32 to vector<8x128xf32>
    %122 = arith.minimumf %121, %120 : vector<8x128xf32>
    %123 = arith.mulf %122, %122 : vector<8x128xf32>
    %cst_39 = arith.constant 9.99999997E-7 : f32
    %124 = vector.broadcast %cst_39 : f32 to vector<8x128xf32>
    %125 = arith.addf %123, %124 : vector<8x128xf32>
    %cst_40 = arith.constant 1.000000e+00 : f32
    %126 = vector.broadcast %cst_40 : f32 to vector<8x128xf32>
    %127 = arith.subf %126, %89 : vector<8x128xf32>
    %cst_41 = arith.constant 1.000000e+00 : f32
    %128 = vector.broadcast %cst_41 : f32 to vector<8x128xf32>
    %129 = arith.mulf %128, %127 : vector<8x128xf32>
    %cst_42 = arith.constant 1.000000e+00 : f32
    %130 = vector.broadcast %cst_42 : f32 to vector<8x128xf32>
    %131 = arith.mulf %130, %66 : vector<8x128xf32>
    %132 = tpu.reciprocal %125 {approx = true} : vector<8x128xf32> -> vector<8x128xf32>
    %133 = arith.mulf %131, %132 : vector<8x128xf32>
    %134 = arith.addf %129, %133 : vector<8x128xf32>
    %c1024_i32_43 = arith.constant 1024 : i32
    %135 = arith.muli %c0_i32, %c1024_i32_43 : i32
    %136 = arith.addi %5, %135 : i32
    %137 = vector.broadcast %136 : i32 to vector<8x128xi32>
    %138 = arith.addi %137, %4 : vector<8x128xi32>
    %c8_i32 = arith.constant 8 : i32
    %139 = vector.broadcast %c8_i32 : i32 to vector<8x128xi32>
    %140 = arith.cmpi slt, %138, %139 : vector<8x128xi32>
    %cst_44 = arith.constant 0.000000e+00 : f32
    %141 = vector.broadcast %cst_44 : f32 to vector<8x128xf32>
    %142 = arith.select %140, %134, %141 : vector<8x128xi1>, vector<8x128xf32>
    %143 = arith.addf %6, %142 : vector<8x128xf32>
    %c1_i32 = arith.constant 1 : i32
    %c0_45 = arith.constant 0 : index
    %c0_46 = arith.constant 0 : index
    %c0_47 = arith.constant 0 : index
    %144 = vector.load %arg2[%c0_45, %c0_46, %c0_47] : memref<1x8x128xf32, #tpu.memory_space<vmem>>, vector<1x8x128xf32>
    %145 = vector.shape_cast %144 : vector<1x8x128xf32> to vector<8x128xf32>
    %146 = vector.shape_cast %143 : vector<8x128xf32> to vector<1x8x128xf32>
    tpu.vector_store %arg2[%c0_45, %c0_46, %c0_47], %146 {strides = array<i32>} : memref<1x8x128xf32, #tpu.memory_space<vmem>>, vector<1x8x128xf32>,
    return
  }
  func.func @transform_0(%arg0: i32) -> (i32, i32, i32, i32) {
    %c0_i32 = arith.constant 0 : i32
    %c0_i32_0 = arith.constant 0 : i32
    %c0_i32_1 = arith.constant 0 : i32
    %c0_i32_2 = arith.constant 0 : i32
    return %c0_i32, %arg0, %c0_i32_0, %c0_i32_1 : i32, i32, i32, i32
  }
  func.func @transform_1(%arg0: i32) -> (i32, i32, i32) {
    %c0_i32 = arith.constant 0 : i32
    %c0_i32_0 = arith.constant 0 : i32
    %c0_i32_1 = arith.constant 0 : i32
    return %arg0, %c0_i32, %c0_i32_0 : i32, i32, i32
  }
}

</mosaic_0001>

<bundles_post_ra>
// kernel: tpu_custom_call.1
= control target key start
LH: loop header
LB: loop body
LE: loop exit
PB: predicated region body
PF: predicated region fallthrough
CT: control target
= control target key end

     0   :  { %6 = vsyncpa [#allocation3], 0  ;;  %s1520_s0 = inlined_call_operand.hbm [shape: f32[8,1,8,128], index: 0, kind: input, shape index: {}]   ;;  %s1521_s1 = inlined_call_operand.hbm [shape: f32[1,8,128], index: 1, kind: output, shape index: {}]  }
   0x1   :  { %7 = vsyncpa [#allocation4], 0  ;;  %s887_s6 = smov [#allocation2]   ;;  %s839_s10 = scalar_lea.hbm %s1520_s0, 1024 }
   0x2   :  { %s13_s7 = sshll.u32 %s887_s6, 4  ;;  %p840_p0 = scmp.ne.s32.totalorder %s1520_s0, %s839_s10  ;;  %s14_s7 = int_to_ptr.vmem [resolvable:$true] %s13_s7 }
   0x3   :  { %p843_p1 = scmp.lt.u32.totalorder %s839_s10, %s1520_s0 }
   0x5   :  { %p845_p2 = pnand %p843_p1, %p840_p0 }
   0x7   :  { %848 = shalt.err (!%p845_p2)
}
   0x8   :  { %s849_s15 = scalar_lea.vmem %s14_s7, 1024  ;;  %p854_p4 = scmp.lt.s32.totalorder %s14_s7, %s14_s7 }
   0x9   :  { %p850_p3 = scmp.ne.s32.totalorder %s14_s7, %s849_s15  ;;  %p855_p5 = scmp.lt.s32.totalorder %s849_s15, %s849_s15 }
   0xb   :  { %p856_p6 = por %p855_p5, %p854_p4 }
   0xd   :  { %p857_p7 = pnand %p856_p6, %p850_p3 }
   0xf   :  { %860 = shalt.err (!%p857_p7)
}
  0x10   :  { %s888_s16 = smov 128   ;;  %s889_s17 = smov 8  }
  0x11   :  { %19 = dma.hbm_to_vmem [thread:$0]  %s1520_s0, 1024, %s14_s7, [#allocation3], %s888_s16, %s888_s16, %s889_s17  }
  0x12   :  { %883 = dma.done.wait [#allocation3], 1024  }
  0x13   :  { %884 = vsyncadd [#allocation3], 4294966272  ;;  %v919_v0 = vld [vmem:[#allocation2] sm:$0xff]  ;;  %v921_v1 = vld [vmem:[#allocation2 + $0x8] sm:$0xff]  ;;  %v890_v48 = vmov 2102212464  }
  0x14   :  { %v923_v2 = vld [vmem:[#allocation2 + $0x10] sm:$0xff]  ;;  %v925_v3 = vld [vmem:[#allocation2 + $0x18] sm:$0xff]  ;;  %v927_v4 = vld [vmem:[#allocation2 + $0x20] sm:$0xff]  ;;  %v891_v50 = vmov 920167782   ;;  %s896_s0 = smov [#allocation5]  }
  0x15   :  { %v929_v5 = vld [vmem:[#allocation2 + $0x28] sm:$0xff]  ;;  %v45_v6 = vadd.f32 %v923_v2, %v919_v0  ;;  %v384_v7 = vsub.f32 %v923_v2, %v919_v0  ;;  %v935_v8 = vld [vmem:[#allocation2 + $0x30] sm:$0xff]  ;;  %v937_v9 = vld [vmem:[#allocation2 + $0x38] sm:$0xff]  ;;  %v376_v10 = vmax.f32 %v919_v0, %v927_v4  ;;  %v385_v12 = vsub.f32 %v925_v3, %v921_v1  ;;  %s742_s20 = sshll.u32 %s896_s0, 4  ;;  %s743_s20 = int_to_ptr.vmem [resolvable:$true] %s742_s20 }
  0x16   :  { %v380_v11 = vmax.f32 %v921_v1, %v929_v5  ;;  %v46_v13 = vadd.f32 %v935_v8, %v927_v4  ;;  %v375_v14 = vmin.f32 %v923_v2, %v935_v8  ;;  %v379_v15 = vmin.f32 %v925_v3, %v937_v9  ;;  %s861_s21 = scalar_lea.vmem %s743_s20, 128  ;;  %p866_p9 = scmp.lt.s32.totalorder %s743_s20, %s743_s20 }
  0x17   :  { %v386_v16 = vmul.f32 %v385_v12, %v384_v7  ;;  %v387_v17 = vsub.f32 %v935_v8, %v927_v4  ;;  %v388_v18 = vsub.f32 %v937_v9, %v929_v5  ;;  %v49_v21 = vadd.f32 %v925_v3, %v921_v1  ;;  %p862_p8 = scmp.ne.s32.totalorder %s743_s20, %s861_s21  ;;  %p867_p10 = scmp.lt.s32.totalorder %s861_s21, %s861_s21 }
  0x18   :  { %v47_v19 = vsub.f32 %v45_v6, %v46_v13  ;;  %v377_v20 = vsub.f32 %v375_v14, %v376_v10  ;;  %v50_v22 = vadd.f32 %v937_v9, %v929_v5  ;;  %v381_v23 = vsub.f32 %v379_v15, %v380_v11 }
  0x19   :  { %v389_v24 = vmul.f32 %v388_v18, %v387_v17  ;;  %v892_v55 = vmov 1326507024   ;;  %v893_v57 = vmov 683565275   ;;  %v894_v59 = vmov 2475754826   ;;  %p868_p11 = por %p867_p10, %p866_p9 }
  0x1a   :  { %v959_v25 = vmul.f32 0.0032724924, %v47_v19  ;;  %v51_v26 = vsub.f32 %v49_v21, %v50_v22  ;;  %v378_v29 = vmax.f32 %v377_v20, 0.0  ;;  %v382_v30 = vmax.f32 %v381_v23, 0.0 }
  0x1b   :  { %v390_v27 = vadd.f32 %v389_v24, %v386_v16  ;;  %v53_v38 = vadd.f32 %v50_v22, %v49_v21  ;;  %v895_v63 = vmov 2131351028   ;;  %p869_p12 = pnand %p868_p11, %p862_p8 }
  0x1c   :  { %v58_v28 = vand.u32 2139095040, %v959_v25  ;;  %v962_v32 = vmul.f32 0.0032724924, %v51_v26  ;;  %v383_v34 = vmul.f32 %v382_v30, %v378_v29  ;;  %v55_v47 = vand.u32 2147483647, %v959_v25 }
  0x1d   :  { %v965_v42 = vmul.f32 0.0032724924, %v53_v38 }
  0x1e   :  { %v59_v31 = vshrl.u32 %v58_v28, 23  ;;  %v161_v36 = vand.u32 2139095040, %v962_v32  ;;  %v391_v37 = vsub.f32 %v390_v27, %v383_v34  ;;  %v62_v12 = vand.u32 8388607, %v55_v47 }
  0x1f   :  { %v264_v46 = vand.u32 2139095040, %v965_v42  ;;  %v158_v38 = vand.u32 2147483647, %v962_v32 }
  0x20   :  { %v751_v33 = vadd.s32 4294967169, %v59_v31  ;;  %v162_v41 = vshrl.u32 %v161_v36, 23  ;;  %v392_v45 = vadd.f32 1e-06, %v391_v37  ;;  %v63_v20 = vor.u32 8388608, %v62_v12 }
  0x21   :  { %v265_v61 = vshrl.u32 %v264_v46, 23  ;;  %v397_v12 = vmax.f32 %v923_v2, %v935_v8  ;;  %v261_v2 = vand.u32 2147483647, %v965_v42 }
  0x22   :  { %v65_v35 = vadd.s32 1, %v751_v33  ;;  %v755_v44 = vadd.s32 4294967169, %v162_v41  ;;  %811 = vrcp.f32 %v392_v45  ;;  %v999_v30 = vshll.u32 %v63_v20, 8 }
  0x23   :  { %v759_v14 = vadd.s32 4294967169, %v265_v61 }
  0x24   :  { %vm66_vm0 = vcmp.gt.s32.totalorder %v65_v35, 0  ;;  %v168_v52 = vadd.s32 1, %v755_v44 }
  0x25   :  { %v67_v39 = vsel %vm66_vm0, %v65_v35, 0  ;;  %v271_v22 = vadd.s32 1, %v759_v14 }
  0x26   :  { %v69_v40 = vand.u32 31, %v67_v39  ;;  %v971_v53 = vshrl.u32 %v67_v39, 5  ;;  %vm169_vm2 = vcmp.gt.s32.totalorder %v168_v52, 0 }
  0x27   :  { %v170_v19 = vsel %vm169_vm2, %v168_v52, 0  ;;  %vm272_vm6 = vcmp.gt.s32.totalorder %v271_v22, 0 }
  0x28   :  { %v70_v43 = vsub.s32 32, %v69_v40  ;;  %v81_v49 = vshll.u32 %v890_v48, %v69_v40  ;;  %v84_v54 = vshll.u32 %v891_v50, %v69_v40  ;;  %v72_v58 = vshll.u32 %v893_v57, %v69_v40 }
  0x29   :  { %v75_v60 = vshll.u32 %v894_v59, %v69_v40  ;;  %v78_v7 = vshll.u32 %v895_v63, %v69_v40  ;;  %vm90_vm1 = vcmp.lt.s32.totalorder %v971_v53, 4  ;;  %vm87_vm3 = vcmp.lt.s32.totalorder %v971_v53, 1 }
  0x2a   :  { %v82_v51 = vshrl.u32 %v891_v50, %v70_v43  ;;  %v85_v56 = vshrl.u32 %v892_v55, %v70_v43  ;;  %v73_v62 = vshrl.u32 %v894_v59, %v70_v43  ;;  %v76_v6 = vshrl.u32 %v895_v63, %v70_v43 }
  0x2b   :  { %v79_v10 = vshrl.u32 %v890_v48, %v70_v43  ;;  %vm89_vm4 = vcmp.lt.s32.totalorder %v971_v53, 3  ;;  %vm88_vm5 = vcmp.lt.s32.totalorder %v971_v53, 2  ;;  %v172_v27 = vand.u32 31, %v170_v19 }
  0x2c   :  { %v83_v11 = vor.u32 %v82_v51, %v81_v49  ;;  %v86_v13 = vor.u32 %v85_v56, %v84_v54  ;;  %v74_v15 = vor.u32 %v73_v62, %v72_v58  ;;  %v77_v16 = vor.u32 %v76_v6, %v75_v60  ;;  %v812_v23 = vpop.eup %811 }
  0x2d   :  { %v80_v17 = vor.u32 %v79_v10, %v78_v7  ;;  %v1003_v33 = vmul.f32 %v812_v23, %v383_v34  ;;  %v1007_v36 = vsub.s32 32, %v172_v27  ;;  %v71_v37 = vshrl.u32 %v893_v57, %v70_v43 }
  0x2e   :  { %v96_v18 = vsel %vm90_vm1, %v83_v11, 920167782  ;;  %v100_v21 = vsel %vm90_vm1, %v86_v13, 1326507024  ;;  %v95_v24 = vsel %vm87_vm3, %v74_v15, %v77_v16  ;;  %v273_v44 = vsel %vm272_vm6, %v271_v22, 0 }
  0x2f   :  { %v97_v26 = vsel %vm89_vm4, %v80_v17, %v96_v18  ;;  %v99_v28 = vsel %vm87_vm3, %v77_v16, %v80_v17  ;;  %v101_v29 = vsel %vm89_vm4, %v83_v11, %v100_v21  ;;  %v92_v39 = vsel %vm90_vm1, %v80_v17, 2102212464 }
  0x30   :  { %v98_v31 = vsel %vm88_vm5, %v95_v24, %v97_v26  ;;  %v102_v35 = vsel %vm88_vm5, %v99_v28, %v101_v29  ;;  %v1022_v46 = vshrl.u32 %v170_v19, 5  ;;  %v175_v49 = vshll.u32 %v893_v57, %v172_v27 }
  0x31   :  { %v1014_v40 = vmul.u32.u64.low %v999_v30, %v98_v31  ;;  %v1015_v41 = vmul.u32.u64.high %v999_v30, %v98_v31, %v1014_v40  ;;  %v1019_v34 = vmul.u32.u64.low %v999_v30, %v102_v35  ;;  %v1020_v45 = vmul.u32.u64.high %v999_v30, %v102_v35, %v1019_v34 }
  0x32   :  { %v184_v43 = vshll.u32 %v890_v48, %v172_v27  ;;  %v185_v51 = vshrl.u32 %v891_v50, %v1007_v36  ;;  %v187_v52 = vshll.u32 %v891_v50, %v172_v27  ;;  %v188_v54 = vshrl.u32 %v892_v55, %v1007_v36 }
  0x33   :  { %v91_v56 = vsel %vm87_vm3, %v71_v37, %v74_v15  ;;  %v93_v58 = vsel %vm89_vm4, %v77_v16, %v92_v39  ;;  %v178_v60 = vshll.u32 %v894_v59, %v172_v27  ;;  %v275_v61 = vand.u32 31, %v273_v44 }
  0x34   :  { %v176_v62 = vshrl.u32 %v894_v59, %v1007_v36  ;;  %v179_v6 = vshrl.u32 %v895_v63, %v1007_v36  ;;  %v181_v7 = vshll.u32 %v895_v63, %v172_v27  ;;  %v182_v10 = vshrl.u32 %v890_v48, %v1007_v36 }
  0x35   :  { %v395_v11 = vmin.f32 %v919_v0, %v927_v4  ;;  %v165_v13 = vand.u32 8388607, %v158_v38  ;;  %v186_v14 = vor.u32 %v185_v51, %v184_v43  ;;  %v189_v15 = vor.u32 %v188_v54, %v187_v52 }
  0x36   :  { %v94_v16 = vsel %vm88_vm5, %v91_v56, %v93_v58  ;;  %vm193_vm7 = vcmp.lt.s32.totalorder %v1022_v46, 4  ;;  %v1052_v17 = vsub.s32 32, %v275_v61  ;;  %v113_v18 = vadd.s32 1, %v1015_v41 }
  0x37   :  { %v177_v19 = vor.u32 %v176_v62, %v175_v49  ;;  %v180_v20 = vor.u32 %v179_v6, %v178_v60  ;;  %v183_v0 = vor.u32 %v182_v10, %v181_v7  ;;  %vm112_vm8 = vc.u32 %v1020_v45, %v1014_v40 }
  0x38   :  { %vm190_vm9 = vcmp.lt.s32.totalorder %v1022_v46, 1  ;;  %v399_v4 = vsub.f32 %v395_v11, %v397_v12  ;;  %v166_v8 = vor.u32 8388608, %v165_v13  ;;  %vm192_vm10 = vcmp.lt.s32.totalorder %v1022_v46, 3 }
  0x39   :  { %v199_v53 = vsel %vm193_vm7, %v186_v14, 920167782  ;;  %v203_v21 = vsel %vm193_vm7, %v189_v15, 1326507024  ;;  %v110_v22 = vmul.u32 %v999_v30, %v94_v16  ;;  %vm191_vm11 = vcmp.lt.s32.totalorder %v1022_v46, 2 }
  0x3a   :  { %v287_v23 = vshll.u32 %v890_v48, %v275_v61  ;;  %v288_v24 = vshrl.u32 %v891_v50, %v1052_v17  ;;  %v114_v26 = vsel %vm112_vm8, %v113_v18, %v1015_v41  ;;  %v198_v27 = vsel %vm190_vm9, %v177_v19, %v180_v20 }
  0x3b   :  { %v202_v28 = vsel %vm190_vm9, %v180_v20, %v183_v0  ;;  %v1074_v29 = vshrl.u32 %v273_v44, 5  ;;  %v200_v30 = vsel %vm192_vm10, %v183_v0, %v199_v53  ;;  %v204_v31 = vsel %vm192_vm10, %v186_v14, %v203_v21 }
  0x3c   :  { %v278_v35 = vshll.u32 %v893_v57, %v275_v61  ;;  %v281_v37 = vshll.u32 %v894_v59, %v275_v61  ;;  %v279_v39 = vshrl.u32 %v894_v59, %v1052_v17  ;;  %v282_v41 = vshrl.u32 %v895_v63, %v1052_v17 }
  0x3d   :  { %v284_v34 = vshll.u32 %v895_v63, %v275_v61  ;;  %v285_v44 = vshrl.u32 %v890_v48, %v1052_v17  ;;  %v289_v49 = vor.u32 %v288_v24, %v287_v23  ;;  %v290_v43 = vshll.u32 %v891_v50, %v275_v61 }
  0x3e   :  { %v291_v51 = vshrl.u32 %v892_v55, %v1052_v17  ;;  %v1092_v52 = vmul.f32 0.006544985, %v399_v4  ;;  %v206_v54 = vshll.u32 %v166_v8, 8  ;;  %v268_v56 = vand.u32 8388607, %v261_v2 }
  0x3f   :  { %vm296_vm12 = vcmp.lt.s32.totalorder %v1074_v29, 4  ;;  %v115_v58 = vadd.s32 %v114_v26, %v110_v22  ;;  %v201_v60 = vsel %vm191_vm11, %v198_v27, %v200_v30  ;;  %v205_v62 = vsel %vm191_vm11, %v202_v28, %v204_v31 }
  0x40   :  { %v280_v6 = vor.u32 %v279_v39, %v278_v35  ;;  %v283_v61 = vor.u32 %v282_v41, %v281_v37  ;;  %v286_v7 = vor.u32 %v285_v44, %v284_v34  ;;  %vm293_vm13 = vcmp.lt.s32.totalorder %v1074_v29, 1 }
  0x41   :  { %v292_v10 = vor.u32 %v291_v51, %v290_v43  ;;  %vm295_vm14 = vcmp.lt.s32.totalorder %v1074_v29, 3  ;;  %v302_v11 = vsel %vm296_vm12, %v289_v49, 920167782  ;;  %v408_v12 = vand.u32 2139095040, %v1092_v52 }
  0x42   :  { %v1106_v13 = vmul.u32.u64.low %v206_v54, %v201_v60  ;;  %v1107_v14 = vmul.u32.u64.high %v206_v54, %v201_v60, %v1106_v13  ;;  %v269_v15 = vor.u32 8388608, %v268_v56  ;;  %v174_v16 = vshrl.u32 %v893_v57, %v1007_v36 }
  0x43   :  { %v1112_v18 = vmul.u32.u64.low %v206_v54, %v205_v62  ;;  %v1113_v4 = vmul.u32.u64.high %v206_v54, %v205_v62, %v1112_v18  ;;  %v409_v8 = vshrl.u32 %v408_v12, 23  ;;  %v195_v53 = vsel %vm193_vm7, %v183_v0, 2102212464 }
  0x44   :  { %vm294_vm15 = vcmp.lt.s32.totalorder %v1074_v29, 2  ;;  %v301_v21 = vsel %vm293_vm13, %v280_v6, %v283_v61  ;;  %v303_v22 = vsel %vm295_vm14, %v286_v7, %v302_v11  ;;  %v116_v23 = vadd.s32 536870912, %v115_v58 }
  0x45   :  { %v306_v24 = vsel %vm296_vm12, %v292_v10, 1326507024  ;;  %v764_v36 = vadd.s32 4294967169, %v409_v8  ;;  %v1124_v26 = vshll.u32 %v269_v15, 8  ;;  %v1128_v27 = vmin.f32 %v921_v1, %v929_v5 }
  0x46   :  { %v1132_v0 = vmax.f32 %v925_v3, %v937_v9  ;;  %v194_v28 = vsel %vm190_vm9, %v174_v16, %v177_v19  ;;  %v196_v30 = vsel %vm192_vm10, %v180_v20, %v195_v53  ;;  %v304_v31 = vsel %vm294_vm15, %v301_v21, %v303_v22 }
  0x47   :  { %v415_v35 = vadd.s32 1, %v764_v36  ;;  %v305_v37 = vsel %vm293_vm13, %v283_v61, %v286_v7  ;;  %v307_v1 = vsel %vm295_vm14, %v289_v49, %v306_v24  ;;  %v1144_v5 = vshrl.u32 %v116_v23, 30 }
  0x48   :  { %v401_v3 = vsub.f32 %v1128_v27, %v1132_v0  ;;  %v197_v9 = vsel %vm191_vm11, %v194_v28, %v196_v30  ;;  %v1151_v19 = vmul.u32.u64.low %v1124_v26, %v304_v31  ;;  %v1152_v20 = vmul.u32.u64.high %v1124_v26, %v304_v31, %v1151_v19 }
  0x49   :  { %vm416_vm0 = vcmp.gt.s32.totalorder %v415_v35, 0  ;;  %v216_v39 = vadd.s32 1, %v1107_v14  ;;  %v277_v41 = vshrl.u32 %v893_v57, %v1052_v17  ;;  %v308_v34 = vsel %vm294_vm15, %v305_v37, %v307_v1 }
  0x4a   :  { %v417_v44 = vsel %vm416_vm0, %v415_v35, 0  ;;  %vm215_vm1 = vc.u32 %v1113_v4, %v1106_v13  ;;  %v298_v46 = vsel %vm296_vm12, %v286_v7, 2102212464  ;;  %v118_v49 = vshll.u32 %v1144_v5, 30 }
  0x4b   :  { %v1165_v43 = vmul.f32 0.006544985, %v401_v3  ;;  %v419_v51 = vand.u32 31, %v417_v44  ;;  %v213_v56 = vmul.u32 %v206_v54, %v197_v9  ;;  %v405_v17 = vand.u32 2147483647, %v1092_v52 }
  0x4c   :  { %v1168_v60 = vmul.u32.u64.low %v1124_v26, %v308_v34  ;;  %v1169_v62 = vmul.u32.u64.high %v1124_v26, %v308_v34, %v1168_v60  ;;  %v217_v10 = vsel %vm215_vm1, %v216_v39, %v1107_v14  ;;  %v297_v11 = vsel %vm293_vm13, %v277_v41, %v280_v6 }
  0x4d   :  { %v299_v7 = vsel %vm295_vm14, %v283_v61, %v298_v46  ;;  %v420_v12 = vsub.s32 32, %v419_v51  ;;  %v1177_v15 = vsub.s32 %v115_v58, %v118_v49  ;;  %v511_v16 = vand.u32 2139095040, %v1165_v43 }
  0x4e   :  { %v218_v54 = vadd.s32 %v217_v10, %v213_v56  ;;  %v300_v18 = vsel %vm294_vm15, %v297_v11, %v299_v7  ;;  %v319_v8 = vadd.s32 1, %v1152_v20  ;;  %v412_v14 = vand.u32 8388607, %v405_v17 }
  0x4f   :  { %v422_v53 = vshll.u32 %v893_v57, %v419_v51  ;;  %v423_v6 = vshrl.u32 %v894_v59, %v420_v12  ;;  %v425_v61 = vshll.u32 %v894_v59, %v419_v51  ;;  %v426_v58 = vshrl.u32 %v895_v63, %v420_v12 }
  0x50   :  { %v418_v21 = vshrl.u32 %v417_v44, 5  ;;  %v428_v22 = vshll.u32 %v895_v63, %v419_v51  ;;  %v429_v23 = vshrl.u32 %v890_v48, %v420_v12  ;;  %v431_v29 = vshll.u32 %v890_v48, %v419_v51 }
  0x51   :  { %v432_v24 = vshrl.u32 %v891_v50, %v420_v12  ;;  %v434_v36 = vshll.u32 %v891_v50, %v419_v51  ;;  %v435_v28 = vshrl.u32 %v892_v55, %v420_v12  ;;  %v512_v30 = vshrl.u32 %v511_v16, 23 }
  0x52   :  { %v121_v31 = vsub.s32 0, %v1177_v15  ;;  %v219_v35 = vadd.s32 536870912, %v218_v54  ;;  %v316_v37 = vmul.u32 %v1124_v26, %v300_v18  ;;  %vm318_vm2 = vc.u32 %v1169_v62, %v1151_v19 }
  0x53   :  { %v413_v1 = vor.u32 8388608, %v412_v14  ;;  %v424_v3 = vor.u32 %v423_v6, %v422_v53  ;;  %v427_v9 = vor.u32 %v426_v58, %v425_v61  ;;  %v433_v39 = vor.u32 %v432_v24, %v431_v29 }
  0x54   :  { %v421_v41 = vshrl.u32 %v893_v57, %v420_v12  ;;  %v430_v34 = vor.u32 %v429_v23, %v428_v22  ;;  %vm437_vm3 = vcmp.lt.s32.totalorder %v418_v21, 1  ;;  %vm440_vm4 = vcmp.lt.s32.totalorder %v418_v21, 4 }
  0x55   :  { %v320_v44 = vsel %vm318_vm2, %v319_v8, %v1152_v20  ;;  %v436_v46 = vor.u32 %v435_v28, %v434_v36  ;;  %v768_v49 = vadd.s32 4294967169, %v512_v30  ;;  %v1201_v51 = vshrl.u32 %v219_v35, 30 }
  0x56   :  { %vm439_vm5 = vcmp.lt.s32.totalorder %v418_v21, 3  ;;  %v442_v26 = vsel %vm440_vm4, %v430_v34, 2102212464  ;;  %vm438_vm6 = vcmp.lt.s32.totalorder %v418_v21, 2  ;;  %v445_v56 = vsel %vm437_vm3, %v424_v3, %v427_v9 }
  0x57   :  { %v446_v60 = vsel %vm440_vm4, %v433_v39, 920167782  ;;  %v453_v10 = vshll.u32 %v413_v1, 8  ;;  %v752_v11 = vmin.u32 %v121_v31, %v1177_v15  ;;  %v321_v7 = vadd.s32 %v320_v44, %v316_v37 }
  0x58   :  { %v441_v12 = vsel %vm437_vm3, %v421_v41, %v424_v3  ;;  %v449_v16 = vsel %vm437_vm3, %v427_v9, %v430_v34  ;;  %v443_v18 = vsel %vm439_vm5, %v427_v9, %v442_v26  ;;  %v447_v20 = vsel %vm439_vm5, %v430_v34, %v446_v60 }
  0x59   :  { %v450_v8 = vsel %vm440_vm4, %v436_v46, 1326507024  ;;  %v518_v14 = vadd.s32 1, %v768_v49  ;;  %v221_v53 = vshll.u32 %v1201_v51, 30  ;;  %v448_v6 = vsel %vm438_vm6, %v445_v56, %v447_v20 }
  0x5a   :  { %v451_v61 = vsel %vm439_vm5, %v433_v39, %v450_v8  ;;  %v1213_v22 = vmul.u32.u64.low %v453_v10, %v448_v6  ;;  %v1214_v23 = vmul.u32.u64.high %v453_v10, %v448_v6, %v1213_v22  ;;  %v123_v29 = vclz %v752_v11 }
  0x5b   :  { %v452_v58 = vsel %vm438_vm6, %v449_v16, %v451_v61  ;;  %v444_v24 = vsel %vm438_vm6, %v441_v12, %v443_v18  ;;  %v508_v36 = vand.u32 2147483647, %v1165_v43  ;;  %v322_v28 = vadd.s32 536870912, %v321_v7 }
  0x5c   :  { %v1219_v30 = vmul.u32.u64.low %v453_v10, %v452_v58  ;;  %v1220_v31 = vmul.u32.u64.high %v453_v10, %v452_v58, %v1219_v30  ;;  %vm519_vm7 = vcmp.gt.s32.totalorder %v518_v14, 0  ;;  %v1222_v35 = vsub.s32 %v218_v54, %v221_v53 }
  0x5d   :  { %v520_v37 = vsel %vm519_vm7, %v518_v14, 0  ;;  %v460_v1 = vmul.u32 %v453_v10, %v444_v24  ;;  %v463_v3 = vadd.s32 1, %v1214_v23  ;;  %v753_v39 = vadd.s32 4294967294, %v123_v29 }
  0x5e   :  { %v522_v9 = vand.u32 31, %v520_v37  ;;  %v1225_v41 = vshrl.u32 %v322_v28, 30  ;;  %vm462_vm8 = vc.u32 %v1220_v31, %v1213_v22  ;;  %v515_v21 = vand.u32 8388607, %v508_v36 }
  0x5f   :  { %v224_v44 = vsub.s32 0, %v1222_v35  ;;  %v464_v54 = vsel %vm462_vm8, %v463_v3, %v1214_v23  ;;  %v521_v56 = vshrl.u32 %v520_v37, 5  ;;  %vm754_vm9 = vcmp.lt.s32.totalorder %v753_v39, 0 }
  0x60   :  { %v523_v34 = vsub.s32 32, %v522_v9  ;;  %v525_v46 = vshll.u32 %v893_v57, %v522_v9  ;;  %v528_v49 = vshll.u32 %v894_v59, %v522_v9  ;;  %v465_v26 = vadd.s32 %v464_v54, %v460_v1 }
  0x61   :  { %v403_v11 = vadd.f32 %v1132_v0, %v1128_v27  ;;  %v531_v12 = vshll.u32 %v895_v63, %v522_v9  ;;  %v534_v18 = vshll.u32 %v890_v48, %v522_v9  ;;  %v324_v20 = vshll.u32 %v1225_v41, 30 }
  0x62   :  { %v526_v60 = vshrl.u32 %v894_v59, %v523_v34  ;;  %v529_v10 = vshrl.u32 %v895_v63, %v523_v34  ;;  %v532_v16 = vshrl.u32 %v890_v48, %v523_v34  ;;  %v466_v8 = vadd.s32 536870912, %v465_v26 }
  0x63   :  { %v516_v14 = vor.u32 8388608, %v515_v21  ;;  %v524_v53 = vshrl.u32 %v893_v57, %v523_v34  ;;  %v535_v58 = vshrl.u32 %v891_v50, %v523_v34  ;;  %v537_v23 = vshll.u32 %v891_v50, %v522_v9 }
  0x64   :  { %v527_v6 = vor.u32 %v526_v60, %v525_v46  ;;  %v530_v61 = vor.u32 %v529_v10, %v528_v49  ;;  %v1246_v29 = vshrl.u32 %v466_v8, 30  ;;  %v533_v27 = vor.u32 %v532_v16, %v531_v12 }
  0x65   :  { %v538_v0 = vshrl.u32 %v892_v55, %v523_v34  ;;  %vm540_vm10 = vcmp.lt.s32.totalorder %v521_v56, 1  ;;  %v1249_v24 = vmul.f32 0.006544985, %v403_v11  ;;  %v536_v28 = vor.u32 %v535_v58, %v534_v18 }
  0x66   :  { %vm542_vm11 = vcmp.lt.s32.totalorder %v521_v56, 3  ;;  %vm543_vm12 = vcmp.lt.s32.totalorder %v521_v56, 4  ;;  %v1251_v30 = vsub.s32 %v321_v7, %v324_v20  ;;  %v468_v37 = vshll.u32 %v1246_v29, 30 }
  0x67   :  { %v539_v1 = vor.u32 %v538_v0, %v537_v23  ;;  %vm541_vm13 = vcmp.lt.s32.totalorder %v521_v56, 2  ;;  %v545_v3 = vsel %vm543_vm12, %v533_v27, 2102212464  ;;  %v548_v9 = vsel %vm540_vm10, %v527_v6, %v530_v61 }
  0x68   :  { %v549_v21 = vsel %vm543_vm12, %v536_v28, 920167782  ;;  %v556_v54 = vshll.u32 %v516_v14, 8  ;;  %v756_v34 = vmin.u32 %v224_v44, %v1222_v35  ;;  %v544_v46 = vsel %vm540_vm10, %v524_v53, %v527_v6 }
  0x69   :  { %v550_v49 = vsel %vm542_vm11, %v533_v27, %v549_v21  ;;  %v552_v7 = vsel %vm540_vm10, %v530_v61, %v533_v27  ;;  %v1261_v60 = vsub.s32 %v465_v26, %v468_v37  ;;  %v546_v10 = vsel %vm542_vm11, %v530_v61, %v545_v3 }
  0x6a   :  { %v551_v11 = vsel %vm541_vm13, %v548_v9, %v550_v49  ;;  %v553_v12 = vsel %vm543_vm12, %v539_v1, 1326507024  ;;  %v327_v16 = vsub.s32 0, %v1251_v30  ;;  %v614_v14 = vand.u32 2139095040, %v1249_v24 }
  0x6b   :  { %v554_v18 = vsel %vm542_vm11, %v536_v28, %v553_v12  ;;  %v1269_v20 = vmul.u32.u64.low %v556_v54, %v551_v11  ;;  %v1270_v8 = vmul.u32.u64.high %v556_v54, %v551_v11, %v1269_v20  ;;  %v126_v26 = vsel %vm754_vm9, 0, %v753_v39 }
  0x6c   :  { %v555_v44 = vsel %vm541_vm13, %v552_v7, %v554_v18  ;;  %v226_v53 = vclz %v756_v34  ;;  %v547_v6 = vsel %vm541_vm13, %v544_v46, %v546_v10  ;;  %v471_v61 = vsub.s32 0, %v1261_v60 }
  0x6d   :  { %v1277_v58 = vmul.u32.u64.low %v556_v54, %v555_v44  ;;  %v1278_v23 = vmul.u32.u64.high %v556_v54, %v555_v44, %v1277_v58  ;;  %v615_v27 = vshrl.u32 %v614_v14, 23  ;;  %v760_v0 = vmin.u32 %v327_v16, %v1251_v30 }
  0x6e   :  { %v131_v28 = vsub.s32 4294967266, %v126_v26  ;;  %v563_v37 = vmul.u32 %v556_v54, %v547_v6  ;;  %v566_v1 = vadd.s32 1, %v1270_v8  ;;  %v757_v9 = vadd.s32 4294967294, %v226_v53 }
  0x6f   :  { %v772_v3 = vadd.s32 4294967169, %v615_v27  ;;  %v765_v21 = vmin.u32 %v471_v61, %v1261_v60  ;;  %vm565_vm14 = vc.u32 %v1278_v23, %v1269_v20  ;;  %v111_v56 = vadd.s32 %v1014_v40, %v1020_v45 }
  0x70   :  { %v127_v34 = vsub.s32 32, %v126_v26  ;;  %v329_v46 = vclz %v760_v0  ;;  %v567_v49 = vsel %vm565_vm14, %v566_v1, %v1270_v8  ;;  %v132_v7 = vadd.s32 127, %v131_v28 }
  0x71   :  { %v621_v39 = vadd.s32 1, %v772_v3  ;;  %v568_v10 = vadd.s32 %v567_v49, %v563_v37  ;;  %vm758_vm0 = vcmp.lt.s32.totalorder %v757_v9, 0  ;;  %v473_v54 = vclz %v765_v21 }
  0x72   :  { %v128_v16 = vshll.u32 %v1177_v15, %v126_v26  ;;  %v129_v18 = vshrl.u32 %v111_v56, %v127_v34  ;;  %v761_v44 = vadd.s32 4294967294, %v329_v46  ;;  %v133_v14 = vshll.u32 %v132_v7, 23 }
  0x73   :  { %vm622_vm15 = vcmp.gt.s32.totalorder %v621_v39, 0  ;;  %v569_v11 = vadd.s32 536870912, %v568_v10  ;;  %v1291_v40 = vsel %vm758_vm0, 0, %v757_v9  ;;  %v766_v45 = vadd.s32 4294967294, %v473_v54 }
  0x74   :  { %v623_v12 = vsel %vm622_vm15, %v621_v39, 0  ;;  %v1294_v58 = vor.u32 %v129_v18, %v128_v16  ;;  %v214_v27 = vadd.s32 %v1106_v13, %v1113_v4  ;;  %vm762_vm1 = vcmp.lt.s32.totalorder %v761_v44, 0 }
  0x75   :  { %v1289_v53 = vshrl.u32 %v569_v11, 30  ;;  %v625_v6 = vand.u32 31, %v623_v12  ;;  %v611_v15 = vand.u32 2147483647, %v1249_v24  ;;  %v1299_v26 = vor.u32 4788187, %v133_v14 }
  0x76   :  { %v234_v0 = vsub.s32 4294967266, %v1291_v40  ;;  %v317_v28 = vadd.s32 %v1151_v19, %v1169_v62  ;;  %v230_v4 = vsub.s32 32, %v1291_v40  ;;  %v1311_v21 = vsel %vm762_vm1, 0, %v761_v44 }
  0x77   :  { %v571_v8 = vshll.u32 %v1289_v53, 30  ;;  %v626_v61 = vsub.s32 32, %v625_v6  ;;  %v628_v1 = vshll.u32 %v893_v57, %v625_v6  ;;  %v631_v9 = vshll.u32 %v894_v59, %v625_v6 }
  0x78   :  { %vm767_vm2 = vcmp.lt.s32.totalorder %v766_v45, 0  ;;  %v618_v19 = vand.u32 8388607, %v611_v15  ;;  %v624_v62 = vshrl.u32 %v623_v12, 5  ;;  %v634_v56 = vshll.u32 %v895_v63, %v625_v6 }
  0x79   :  { %v1304_v37 = vsub.s32 %v568_v10, %v571_v8  ;;  %v629_v3 = vshrl.u32 %v894_v59, %v626_v61  ;;  %v632_v13 = vshrl.u32 %v895_v63, %v626_v61  ;;  %v635_v34 = vshrl.u32 %v890_v48, %v626_v61 }
  0x7a   :  { %v231_v59 = vshll.u32 %v1222_v35, %v1291_v40  ;;  %v235_v46 = vadd.s32 127, %v234_v0  ;;  %v333_v49 = vsub.s32 32, %v1311_v21  ;;  %v1322_v10 = vsel %vm767_vm2, 0, %v766_v45 }
  0x7b   :  { %v574_v39 = vsub.s32 0, %v1304_v37  ;;  %v630_v54 = vor.u32 %v629_v3, %v628_v1  ;;  %v633_v11 = vor.u32 %v632_v13, %v631_v9  ;;  %v637_v16 = vshll.u32 %v890_v48, %v625_v6 }
  0x7c   :  { %v638_v12 = vshrl.u32 %v891_v50, %v626_v61  ;;  %v640_v63 = vshll.u32 %v891_v50, %v625_v6  ;;  %v641_v44 = vshrl.u32 %v892_v55, %v626_v61  ;;  %v337_v35 = vsub.s32 4294967266, %v1311_v21 }
  0x7d   :  { %v769_v7 = vmin.u32 %v574_v39, %v1304_v37  ;;  %v619_v14 = vor.u32 8388608, %v618_v19  ;;  %v636_v40 = vor.u32 %v635_v34, %v634_v56  ;;  %vm643_vm3 = vcmp.lt.s32.totalorder %v624_v62, 1 }
  0x7e   :  { %v627_v45 = vshrl.u32 %v893_v57, %v626_v61  ;;  %v639_v0 = vor.u32 %v638_v12, %v637_v16  ;;  %vm645_vm4 = vcmp.lt.s32.totalorder %v624_v62, 3  ;;  %v481_v1 = vsub.s32 4294967266, %v1322_v10 }
  0x7f   :  { %v576_v18 = vclz %v769_v7  ;;  %v642_v48 = vor.u32 %v641_v44, %v640_v63  ;;  %vm644_vm5 = vcmp.lt.s32.totalorder %v624_v62, 2  ;;  %vm646_vm6 = vcmp.lt.s32.totalorder %v624_v62, 4 }
  0x80   :  { %v648_v50 = vsel %vm646_vm6, %v636_v40, 2102212464  ;;  %v651_v55 = vsel %vm643_vm3, %v630_v54, %v633_v11  ;;  %v652_v6 = vsel %vm646_vm6, %v639_v0, 920167782  ;;  %v338_v3 = vadd.s32 127, %v337_v35 }
  0x81   :  { %v770_v8 = vadd.s32 4294967294, %v576_v18  ;;  %v653_v13 = vsel %vm645_vm4, %v636_v40, %v652_v6  ;;  %v659_v39 = vshll.u32 %v619_v14, 8  ;;  %v461_v57 = vadd.s32 %v1213_v22, %v1220_v31 }
  0x82   :  { %v647_v61 = vsel %vm643_vm3, %v627_v45, %v630_v54  ;;  %v649_v19 = vsel %vm645_vm4, %v633_v11, %v648_v50  ;;  %v655_v56 = vsel %vm643_vm3, %v633_v11, %v636_v40  ;;  %v477_v34 = vsub.s32 32, %v1322_v10 }
  0x83   :  { %vm771_vm7 = vcmp.lt.s32.totalorder %v770_v8, 0  ;;  %v482_v7 = vadd.s32 127, %v481_v1  ;;  %v654_v16 = vsel %vm644_vm5, %v651_v55, %v653_v13  ;;  %v656_v18 = vsel %vm646_vm6, %v642_v48, 1326507024 }
  0x84   :  { %v579_v9 = vsel %vm771_vm7, 0, %v770_v8  ;;  %v232_v12 = vshrl.u32 %v214_v27, %v230_v4  ;;  %v236_v63 = vshll.u32 %v235_v46, 23  ;;  %v657_v35 = vsel %vm645_vm4, %v639_v0, %v656_v18 }
  0x85   :  { %v584_v44 = vsub.s32 4294967266, %v579_v9  ;;  %v650_v22 = vsel %vm644_vm5, %v647_v61, %v649_v19  ;;  %v658_v31 = vsel %vm644_vm5, %v655_v56, %v657_v35  ;;  %v334_v11 = vshll.u32 %v1251_v30, %v1311_v21 }
  0x86   :  { %v1346_v54 = vmul.u32.u64.low %v659_v39, %v654_v16  ;;  %v1347_v14 = vmul.u32.u64.high %v659_v39, %v654_v16, %v1346_v54  ;;  %v335_v40 = vshrl.u32 %v317_v28, %v333_v49  ;;  %v339_v27 = vshll.u32 %v338_v3, 23 }
  0x87   :  { %v1352_v8 = vmul.u32.u64.low %v659_v39, %v658_v31  ;;  %v1353_v45 = vmul.u32.u64.high %v659_v39, %v658_v31, %v1352_v8  ;;  %v478_v4 = vshll.u32 %v1261_v60, %v1322_v10  ;;  %v479_v46 = vshrl.u32 %v461_v57, %v477_v34 }
  0x88   :  { %v483_v0 = vshll.u32 %v482_v7, 23  ;;  %v564_v62 = vadd.s32 %v1269_v20, %v1278_v23  ;;  %v580_v1 = vsub.s32 32, %v579_v9  ;;  %v585_v48 = vadd.s32 127, %v584_v44 }
  0x89   :  { %v666_v50 = vmul.u32 %v659_v39, %v650_v22  ;;  %v233_v55 = vor.u32 %v232_v12, %v231_v59  ;;  %v237_v6 = vor.u32 4788187, %v236_v63  ;;  %v669_v30 = vadd.s32 1, %v1347_v14 }
  0x8a   :  { %v135_v28 = vand.u32 2147483647, %v1299_v26  ;;  %v137_v21 = vcvt.s32.f32 %v1294_v58  ;;  %v336_v49 = vor.u32 %v335_v40, %v334_v11  ;;  %vm668_vm8 = vc.u32 %v1353_v45, %v1346_v54 }
  0x8b   :  { %v340_v60 = vor.u32 4788187, %v339_v27  ;;  %v480_v10 = vor.u32 %v479_v46, %v478_v4  ;;  %v484_v3 = vor.u32 4788187, %v483_v0  ;;  %v670_v20 = vsel %vm668_vm8, %v669_v30, %v1347_v14 }
  0x8c   :  { %v581_v23 = vshll.u32 %v1304_v37, %v579_v9  ;;  %v582_v13 = vshrl.u32 %v564_v62, %v580_v1  ;;  %v586_v59 = vshll.u32 %v585_v48, 23  ;;  %v671_v39 = vadd.s32 %v670_v20, %v666_v50 }
  0x8d   :  { %v238_v57 = vand.u32 2147483647, %v237_v6  ;;  %v240_v61 = vcvt.s32.f32 %v233_v55  ;;  %v138_v26 = vmul.f32 %v137_v21, %v135_v28  ;;  %v341_v56 = vand.u32 2147483647, %v340_v60 }
  0x8e   :  { %v672_v19 = vadd.s32 536870912, %v671_v39  ;;  %v343_v58 = vcvt.s32.f32 %v336_v49  ;;  %v487_v34 = vcvt.s32.f32 %v480_v10  ;;  %v485_v7 = vand.u32 2147483647, %v484_v3 }
  0x8f   :  { %v583_v16 = vor.u32 %v582_v13, %v581_v23  ;;  %v587_v18 = vor.u32 4788187, %v586_v59  ;;  %v241_v63 = vmul.f32 %v240_v61, %v238_v57  ;;  %vm57_vm9 = vcmp.lt.s32.totalorder %v959_v25, 0 }
  0x90   :  { %v1366_v12 = vshrl.u32 %v672_v19, 30  ;;  %v139_v37 = vxor.u32 2147483648, %v138_v26  ;;  %v344_v9 = vmul.f32 %v343_v58, %v341_v56  ;;  %v488_v35 = vmul.f32 %v487_v34, %v485_v7 }
  0x91   :  { %v588_v22 = vand.u32 2147483647, %v587_v18  ;;  %v590_v31 = vcvt.s32.f32 %v583_v16  ;;  %v242_v11 = vxor.u32 2147483648, %v241_v63  ;;  %vm160_vm10 = vcmp.lt.s32.totalorder %v962_v32, 0 }
  0x92   :  { %v674_v44 = vshll.u32 %v1366_v12, 30  ;;  %vm1373_vm11 = vcmp.le.f32.partialorder %v55_v47, 0.7853982  ;;  %v140_v27 = vsel %vm57_vm9, %v139_v37, %v138_v26  ;;  %v345_v4 = vxor.u32 2147483648, %v344_v9 }
  0x93   :  { %vm263_vm12 = vcmp.lt.s32.totalorder %v965_v42, 0  ;;  %v489_v46 = vxor.u32 2147483648, %v488_v35  ;;  %v591_v0 = vmul.f32 %v590_v31, %v588_v22  ;;  %vm1382_vm13 = vcmp.le.f32.partialorder %v158_v38, 0.7853982 }
  0x94   :  { %v675_v14 = vsub.s32 %v671_v39, %v674_v44  ;;  %v243_v47 = vsel %vm160_vm10, %v242_v11, %v241_v63  ;;  %vm407_vm14 = vcmp.lt.s32.totalorder %v1092_v52, 0  ;;  %v143_v48 = vsel %vm1373_vm11, %v959_v25, %v140_v27 }
  0x95   :  { %vm1394_vm15 = vcmp.le.f32.partialorder %v261_v2, 0.7853982  ;;  %v346_v38 = vsel %vm263_vm12, %v345_v4, %v344_v9  ;;  %vm1402_vm0 = vcmp.le.f32.partialorder %v405_v17, 0.7853982  ;;  %v246_v30 = vsel %vm1382_vm13, %v962_v32, %v243_v47 }
  0x96   :  { %v677_v40 = vsub.s32 0, %v675_v14  ;;  %v490_v28 = vsel %vm407_vm14, %v489_v46, %v488_v35  ;;  %v592_v2 = vxor.u32 2147483648, %v591_v0  ;;  %v141_v49 = vsub.s32 4, %v1144_v5 }
  0x97   :  { %813 = vcosq.f32 %v143_v48  ;;  %vm510_vm1 = vcmp.lt.s32.totalorder %v1165_v43, 0  ;;  %v349_v17 = vsel %vm1394_vm15, %v965_v42, %v346_v38  ;;  %v667_v60 = vadd.s32 %v1346_v54, %v1353_v45 }
  0x98   :  { %v773_v62 = vmin.u32 %v677_v40, %v675_v14  ;;  %815 = vsinq.f32 %v143_v48  ;;  %v493_v10 = vsel %vm1402_vm0, %v1092_v52, %v490_v28  ;;  %vm1423_vm3 = vcmp.le.f32.partialorder %v508_v36, 0.7853982 }
  0x99   :  { %817 = vcosq.f32 %v246_v30  ;;  %v593_v23 = vsel %vm510_vm1, %v592_v2, %v591_v0  ;;  %v347_v54 = vsub.s32 4, %v1225_v41  ;;  %v491_v45 = vsub.s32 4, %v1246_v29 }
  0x9a   :  { %v679_v50 = vclz %v773_v62  ;;  %819 = vcosq.f32 %v349_v17  ;;  %v142_v36 = vsel %vm57_vm9, %v141_v49, %v1144_v5  ;;  %v244_v19 = vsub.s32 4, %v1201_v51 }
  0x9b   :  { %821 = vcosq.f32 %v493_v10  ;;  %v596_v26 = vsel %vm1423_vm3, %v1165_v43, %v593_v23  ;;  %v348_v34 = vsel %vm263_vm12, %v347_v54, %v1225_v41  ;;  %v492_v7 = vsel %vm407_vm14, %v491_v45, %v1246_v29 }
  0x9c   :  { %v774_v21 = vadd.s32 4294967294, %v679_v50  ;;  %823 = vsinq.f32 %v493_v10  ;;  %v144_v5 = vsel %vm1373_vm11, 0, %v142_v36  ;;  %v245_v44 = vsel %vm160_vm10, %v244_v19, %v1201_v51 }
  0x9d   :  { %825 = vsinq.f32 %v349_v17  ;;  %v594_v37 = vsub.s32 4, %v1289_v53  ;;  %v350_v41 = vsel %vm1394_vm15, 0, %v348_v34  ;;  %v494_v29 = vsel %vm1402_vm0, 0, %v492_v7 }
  0x9e   :  { %vm775_vm2 = vcmp.lt.s32.totalorder %v774_v21, 0  ;;  %827 = vsinq.f32 %v246_v30  ;;  %v148_v31 = vand.u32 3, %v144_v5  ;;  %v354_v51 = vand.u32 3, %v350_v41 }
  0x9f   :  { %v682_v20 = vsel %vm775_vm2, 0, %v774_v21  ;;  %829 = vcosq.f32 %v596_v26  ;;  %v498_v8 = vand.u32 3, %v494_v29  ;;  %v595_v27 = vsel %vm510_vm1, %v594_v37, %v1289_v53 }
  0xa0   :  { %v683_v13 = vsub.s32 32, %v682_v20  ;;  %v684_v59 = vshll.u32 %v675_v14, %v682_v20  ;;  %v687_v39 = vsub.s32 4294967266, %v682_v20  ;;  %831 = vsinq.f32 %v596_v26 }
  0xa1   :  { %v814_v63 = vpop.eup %813  ;;  %v247_v14 = vsel %vm1382_vm13, 0, %v245_v44  ;;  %vm613_vm4 = vcmp.lt.s32.totalorder %v1249_v24, 0  ;;  %vm1464_vm5 = vcmp.le.f32.partialorder %v611_v15, 0.7853982  ;;  %v697_v62 = vsub.s32 4, %v1366_v12 }
  0xa2   :  { %v685_v57 = vshrl.u32 %v667_v60, %v683_v13  ;;  %v688_v61 = vadd.s32 127, %v687_v39  ;;  %v816_v9 = vpop.eup %815  ;;  %vm149_vm6 = vcmp.lt.s32.totalorder %v148_v31, 2  ;;  %vm150_vm7 = vcmp.eq.s32.totalorder %v148_v31, 0 }
  0xa3   :  { %v1454_v22 = vpop.eup %817  ;;  %vm153_vm8 = vcmp.eq.s32.totalorder %v148_v31, 2  ;;  %v1469_v47 = vand.u32 3, %v247_v14  ;;  %v151_v53 = vxor.u32 2147483648, %v816_v9  ;;  %v154_v50 = vxor.u32 2147483648, %v814_v63 }
  0xa4   :  { %v686_v56 = vor.u32 %v685_v57, %v684_v59  ;;  %v689_v58 = vshll.u32 %v688_v61, 23  ;;  %v820_v40 = vpop.eup %819  ;;  %v597_v55 = vsel %vm1423_vm3, 0, %v595_v27  ;;  %vm355_vm9 = vcmp.lt.s32.totalorder %v354_v51, 2 }
  0xa5   :  { %v822_v4 = vpop.eup %821  ;;  %vm500_vm10 = vcmp.eq.s32.totalorder %v498_v8, 0  ;;  %vm503_vm11 = vcmp.eq.s32.totalorder %v498_v8, 2  ;;  %v698_v21 = vsel %vm613_vm4, %v697_v62, %v1366_v12  ;;  %v360_v60 = vxor.u32 2147483648, %v820_v40 }
  0xa6   :  { %v690_v16 = vor.u32 4788187, %v689_v58  ;;  %v693_v18 = vcvt.s32.f32 %v686_v56  ;;  %v824_v1 = vpop.eup %823  ;;  %v504_v2 = vxor.u32 2147483648, %v822_v4  ;;  %v601_v10 = vand.u32 3, %v597_v55 }
  0xa7   :  { %v826_v48 = vpop.eup %825  ;;  %v501_v28 = vxor.u32 2147483648, %v824_v1  ;;  %v152_v3 = vsel %vm150_vm7, %v814_v63, %v151_v53  ;;  %v155_v20 = vsel %vm153_vm8, %v154_v50, %v816_v9  ;;  %vm356_vm12 = vcmp.eq.s32.totalorder %v354_v51, 0 }
  0xa8   :  { %v691_v35 = vand.u32 2147483647, %v690_v16  ;;  %v828_v38 = vpop.eup %827  ;;  %v357_v17 = vxor.u32 2147483648, %v826_v48  ;;  %vm359_vm13 = vcmp.eq.s32.totalorder %v354_v51, 2  ;;  %v257_v13 = vxor.u32 2147483648, %v1454_v22 }
  0xa9   :  { %v830_v30 = vpop.eup %829  ;;  %v254_v23 = vxor.u32 2147483648, %v828_v38  ;;  %vm499_vm14 = vcmp.lt.s32.totalorder %v498_v8, 2  ;;  %v700_v59 = vsel %vm1464_vm5, 0, %v698_v21  ;;  %v502_v12 = vsel %vm500_vm10, %v822_v4, %v501_v28 }
  0xaa   :  { %v694_v11 = vmul.f32 %v693_v18, %v691_v35  ;;  %v832_v49 = vpop.eup %831  ;;  %v505_v39 = vsel %vm503_vm11, %v504_v2, %v824_v1  ;;  %v607_v45 = vxor.u32 2147483648, %v830_v30  ;;  %v358_v57 = vsel %vm356_vm12, %v820_v40, %v357_v17 }
  0xab   :  { %v604_v54 = vxor.u32 2147483648, %v832_v49  ;;  %v361_v61 = vsel %vm359_vm13, %v360_v60, %v826_v48  ;;  %vm603_vm15 = vcmp.eq.s32.totalorder %v601_v10, 0  ;;  %vm606_vm0 = vcmp.eq.s32.totalorder %v601_v10, 2 }
  0xac   :  { %v695_v0 = vxor.u32 2147483648, %v694_v11  ;;  %vm147_vm1 = vweird.f32 %v959_v25  ;;  %vm253_vm2 = vcmp.eq.s32.totalorder %v1469_v47, 0  ;;  %vm256_vm3 = vcmp.eq.s32.totalorder %v1469_v47, 2 }
  0xad   :  { %v704_v36 = vand.u32 3, %v700_v59  ;;  %v156_v19 = vsel %vm149_vm6, %v152_v3, %v155_v20  ;;  %v506_v26 = vsel %vm499_vm14, %v502_v12, %v505_v39  ;;  %v362_v56 = vsel %vm355_vm9, %v358_v57, %v361_v61 }
  0xae   :  { %v696_v15 = vsel %vm613_vm4, %v695_v0, %v694_v11  ;;  %vm353_vm4 = vweird.f32 %v965_v42  ;;  %vm602_vm7 = vcmp.lt.s32.totalorder %v601_v10, 2  ;;  %v605_v58 = vsel %vm603_vm15, %v830_v30, %v604_v54 }
  0xaf   :  { %v699_v6 = vsel %vm1464_vm5, %v1249_v24, %v696_v15  ;;  %vm497_vm5 = vweird.f32 %v1092_v52  ;;  %v608_v34 = vsel %vm606_vm0, %v607_v45, %v832_v49  ;;  %vm252_vm8 = vcmp.lt.s32.totalorder %v1469_v47, 2 }
  0xb0   :  { %833 = vcosq.f32 %v699_v6  ;;  %v255_v7 = vsel %vm253_vm2, %v1454_v22, %v254_v23  ;;  %v258_v5 = vsel %vm256_vm3, %v257_v13, %v828_v38  ;;  %v157_v18 = vsel %vm147_vm1, nan, %v156_v19 }
  0xb1   :  { %835 = vsinq.f32 %v699_v6  ;;  %v507_v63 = vsel %vm497_vm5, nan, %v506_v26  ;;  %vm600_vm6 = vweird.f32 %v1165_v43  ;;  %vm709_vm10 = vcmp.eq.s32.totalorder %v704_v36, 2 }
  0xb2   :  { %v363_v44 = vsel %vm353_vm4, nan, %v362_v56  ;;  %v609_v37 = vsel %vm602_vm7, %v605_v58, %v608_v34  ;;  %vm706_vm9 = vcmp.eq.s32.totalorder %v704_v36, 0  ;;  %vm250_vm11 = vweird.f32 %v962_v32 }
  0xb3   :  { %v259_v41 = vsel %vm252_vm8, %v255_v7, %v258_v5  ;;  %vm705_vm12 = vcmp.lt.s32.totalorder %v704_v36, 2  ;;  %v365_v35 = vadd.f32 1.0, %v157_v18  ;;  %vm703_vm13 = vweird.f32 %v1249_v24 }
  0xb4   :  { %v715_v22 = vadd.f32 1.0, %v507_v63  ;;  %v364_v31 = vsub.f32 0.0, %v363_v44  ;;  %v763_v14 = vadd.f32 -1.0, %v157_v18  ;;  %v610_v11 = vsel %vm600_vm6, nan, %v609_v37 }
  0xb5   :  { %v260_v40 = vsel %vm250_vm11, nan, %v259_v41  ;;  %v776_v8 = vadd.f32 -1.0, %v507_v63  ;;  %v23_v43 = vlaneseq  ;;  %v726_v10 = vsub.f32 1.0, %v1003_v33 }
  0xb6   :  { %v716_v32 = vmul.f32 %v715_v22, %v610_v11  ;;  %v366_v46 = vmul.f32 %v365_v35, %v260_v40  ;;  %v368_v0 = vmul.f32 %v763_v14, %v364_v31 }
  0xb7   :  { %v24_v28 = vshrl.u32 %v23_v43, 7  ;;  %v27_v49 = vand.u32 127, %v23_v43 }
  0xb8   :  { %v369_v47 = vadd.f32 %v368_v0, %v366_v46 }
  0xb9   :  { %v25_v21 = vmul.u32 128, %v24_v28 }
  0xba   :  { %v834_v16 = vpop.eup %833  ;;  %v370_v53 = vmul.f32 0.5, %v369_v47 }
  0xbb   :  { %v836_v52 = vpop.eup %835  ;;  %v710_v9 = vxor.u32 2147483648, %v834_v16  ;;  %v28_v60 = vadd.s32 %v27_v49, %v25_v21 }
  0xbc   :  { %v707_v29 = vxor.u32 2147483648, %v836_v52  ;;  %v371_v15 = vsub.f32 1.0, %v370_v53 }
  0xbd   :  { %v711_v25 = vsel %vm709_vm10, %v710_v9, %v836_v52  ;;  %vm732_vm14 = vcmp.lt.s32.totalorder %v28_v60, 8 }
  0xbe   :  { %v708_v42 = vsel %vm706_vm9, %v834_v16, %v707_v29  ;;  %v372_v30 = vmax.f32 %v371_v15, 0.0 }
  0xbf   :  { %v712_v51 = vsel %vm705_vm12, %v708_v42, %v711_v25 }
  0xc0   :  { %v713_v27 = vsel %vm703_vm13, nan, %v712_v51  ;;  %v373_v2 = vmin.f32 %v372_v30, 2.0 }
  0xc1   :  { %v714_v4 = vsub.f32 0.0, %v713_v27 }
  0xc2   :  { %v374_v17 = vmul.f32 %v373_v2, %v373_v2 }
  0xc3   :  { %v718_v62 = vmul.f32 %v776_v8, %v714_v4 }
  0xc5   :  { %v719_v1 = vadd.f32 %v718_v62, %v716_v32 }
  0xc7   :  { %v720_v24 = vmul.f32 0.5, %v719_v1 }
  0xc9   :  { %v721_v48 = vsub.f32 1.0, %v720_v24 }
  0xcb   :  { %v722_v50 = vmax.f32 %v721_v48, 0.0 }
  0xcd   :  { %v723_v55 = vmin.f32 %v722_v50, 2.0 }
  0xcf   :  { %v724_v38 = vmul.f32 %v723_v55, %v723_v55 }
  0xd1   :  { %v725_v6 = vadd.f32 1e-06, %v724_v38 }
  0xd3   :  { %837 = vrcp.f32 %v725_v6 }
  0xdd   :  { %v838_v3 = vpop.eup %837 }
  0xde   :  { %v728_v20 = vmul.f32 %v838_v3, %v374_v17 }
  0xe0   :  { %v729_v23 = vadd.f32 %v728_v20, %v726_v10 }
  0xe2   :  { %v733_v13 = vsel %vm732_vm14, %v729_v23, 0.0 }
  0xe3   :  { %735 = vst [vmem:[#allocation5] sm:$0xff] %v733_v13 }
  0xe4   :  { %872 = shalt.err (!%p869_p12)
}
  0xe5   :  { %s873_s24 = scalar_lea.hbm %s1521_s1, 128 }
  0xe6   :  { %p874_p13 = scmp.ne.s32.totalorder %s1521_s1, %s873_s24  ;;  %p877_p0 = scmp.lt.u32.totalorder %s873_s24, %s1521_s1 }
  0xe8   :  { %p879_p1 = pnand %p877_p0, %p874_p13 }
  0xea   :  { %882 = shalt.err (!%p879_p1)
}
  0xeb   :  { %745 = dma.vmem_to_hbm [thread:$0]  %s743_s20, 128, %s1521_s1, [#allocation4]  }
  0xec   :  { %885 = dma.done.wait [#allocation4], 128  }
  0xed   :  { %886 = vsyncadd [#allocation4], 4294967168 }
  0xee   :  { %749 = vsyncpa [#allocation3], 1 }
  0xef   :  { %750 = vsyncpa [#allocation4], 1 }

</bundles_post_ra>
